<compile_context>
chip_gen: v7x
topology: tpu7x:2x2x1
jax: 0.10.0
libtpu: 0.0.40
codegen_flags: <defaults>
</compile_context>

<pallas_src>
import functools
import math

import jax
import jax.numpy as jnp
from jax import lax
from jax.experimental import pallas as pl
from jax.experimental.pallas import tpu as pltpu


def _round_up(n, k):
    return ((n + k - 1) // k) * k


def mlp_kernel(x_ref, w1_ref, b1_ref, w2_ref, b2_ref, w3_ref, b3_ref, oT_ref):
    # x_ref : [tm, c_in]   (natural layout; no wrapper-side transpose)
    # w_k   : [out_k, in_k] (torch layout)    b_k : [out_k, 1] (f32)
    # oT    : [c_out, tm]  (lane-dense output slab)
    x = x_ref[...].astype(w1_ref.dtype)          # in-VMEM cast (no-op for f32)
    # Layer 1: h^T = W1 @ x^T  (contract c_in of both operands -> [c_hid, tm])
    h = lax.dot_general(w1_ref[...], x,
                        dimension_numbers=(((1,), (1,)), ((), ())),
                        preferred_element_type=jnp.float32)
    h = jnp.maximum(h + b1_ref[...], 0.0)        # bias + ReLU in f32
    # Mid layer (n_midlayers=1): Linear + ReLU
    h = jnp.dot(w2_ref[...], h.astype(w2_ref.dtype), preferred_element_type=jnp.float32)
    h = jnp.maximum(h + b2_ref[...], 0.0)
    # Output layer: Linear (bias add in f32, single cast on store)
    out = jnp.dot(w3_ref[...], h.astype(w3_ref.dtype), preferred_element_type=jnp.float32)
    oT_ref[...] = (out + b3_ref[...]).astype(oT_ref.dtype)


@functools.partial(jax.jit, static_argnames=("tm", "use_bf16"))
def mlp_pallas(x, params, *, tm=2048, use_bf16=False):
    """x: [..., C_in] -> [..., C_out].  Fused 3-layer MLP (Linear-ReLU-Linear-ReLU-Linear)."""
    w1, b1, w2, b2, w3, b3 = params          # torch layout: W [out, in], b [out, 1]
    c_in, c_hid, c_out = w1.shape[1], w1.shape[0], w3.shape[0]

    batch_shape = x.shape[:-1]
    m = math.prod(batch_shape)
    x2d = x.reshape(m, c_in)

    # Row tile (multiple of 128; batch rows land on the lane axis of the output).
    # Cap at ~half of the padded batch so the grid has >= 2 parallel steps whenever
    # m > 128 (both v7x TensorCores get work); clamp to the requested tm.
    m128 = _round_up(m, 128)
    half = _round_up(pl.cdiv(m128, 2), 128)
    tm_eff = max(128, min(tm, half))
    m_pad = _round_up(m, tm_eff)
    if m_pad != m:
        x2d = jnp.pad(x2d, ((0, m_pad - m), (0, 0)))   # only touches HBM for ragged batches

    # Resident (tiny) weights may be cast in the wrapper; activations are NOT —
    # they stay in x.dtype in HBM and are cast inside the kernel (free VPU work).
    w_dtype = jnp.bfloat16 if use_bf16 else w1.dtype
    w1c, w2c, w3c = (w.astype(w_dtype) for w in (w1, w2, w3))
    b1c, b2c, b3c = (b.astype(jnp.float32) for b in (b1, b2, b3))
    # NOTE: per-step [c,1]->[c,tm] lane-broadcast of each bias is negligible VPU/XLU
    # work under MXU/DMA slack (review item marked "minor"); kept as [c,1] refs.

    grid = (m_pad // tm_eff,)
    row = lambda i: (i, 0)       # x tiles over the flattened batch rows
    full = lambda i: (0, 0)      # weights/biases resident across all tiles
    col = lambda i: (0, i)       # lane-dense output tile

    in_item = x2d.dtype.itemsize
    out_item = x.dtype.itemsize
    flops = 2 * m_pad * (c_in * c_hid + c_hid * c_hid + c_hid * c_out)
    weight_bytes = sum(a.size * a.dtype.itemsize for a in (w1c, b1c, w2c, b2c, w3c, b3c))
    bytes_accessed = m_pad * c_in * in_item + weight_bytes + c_out * m_pad * out_item

    # VMEM budget: double-buffered x/out tiles (with (8,128) padding), the two f32
    # [c_hid, tm] intermediates, resident weights, 2x headroom; capped at 48 MiB
    # (below v7x's 64 MiB physical VMEM), floored at 8 MiB.
    def _vmem_bytes(rows, cols, itemsize):
        return _round_up(rows, 8) * _round_up(cols, 128) * itemsize

    tile_bytes = (2 * _vmem_bytes(tm_eff, c_in, in_item)        # x tiles (lane-padded)
                  + 2 * _vmem_bytes(c_out, tm_eff, out_item)    # out tiles
                  + 2 * _vmem_bytes(c_hid, tm_eff, 4))          # f32 hidden intermediates
    weight_vmem = (_vmem_bytes(c_hid, c_in, w1c.dtype.itemsize)
                   + _vmem_bytes(c_hid, c_hid, w2c.dtype.itemsize)
                   + _vmem_bytes(c_out, c_hid, w3c.dtype.itemsize)
                   + 3 * _vmem_bytes(c_hid, 1, 4))
    vmem_limit = int(min(max(2 * (tile_bytes + weight_vmem), 8 << 20), 48 << 20))

    outT = pl.pallas_call(
        mlp_kernel,
        out_shape=jax.ShapeDtypeStruct((c_out, m_pad), x.dtype),
        grid_spec=pltpu.PrefetchScalarGridSpec(
            num_scalar_prefetch=0,
            grid=grid,
            in_specs=[
                pl.BlockSpec((tm_eff, c_in), row),     # x tile, natural layout
                pl.BlockSpec((c_hid, c_in), full),     # W1 (resident)
                pl.BlockSpec((c_hid, 1), full),        # b1
                pl.BlockSpec((c_hid, c_hid), full),    # W2
                pl.BlockSpec((c_hid, 1), full),        # b2
                pl.BlockSpec((c_out, c_hid), full),    # W3
                pl.BlockSpec((c_out, 1), full),        # b3
            ],
            out_specs=pl.BlockSpec((c_out, tm_eff), col),   # lane-dense output slab
        ),
        compiler_params=pltpu.CompilerParams(
            dimension_semantics=("parallel",),
            vmem_limit_bytes=vmem_limit,
        ),
        cost_estimate=pl.CostEstimate(
            flops=flops, transcendentals=0, bytes_accessed=bytes_accessed),
    )(x2d, w1c, b1c, w2c, b2c, w3c, b3c)

    out2d = outT.T[:m]
    return out2d.reshape(*batch_shape, c_out)


def init_mlp_params(key, input_channel, hidden_dim, output_channel,
                    forward_expansion=1, dtype=jnp.float32):
    """Mimics torch.nn.Linear init (uniform +/- 1/sqrt(fan_in)).
    Torch layout: W [out_features, in_features], b [out_features, 1]."""
    h = hidden_dim * forward_expansion
    dims = [(input_channel, h), (h, h), (h, output_channel)]
    params = []
    for fan_in, fan_out in dims:
        key, kw, kb = jax.random.split(key, 3)
        bound = 1.0 / (fan_in ** 0.5)
        w = jax.random.uniform(kw, (fan_out, fan_in), dtype, minval=-bound, maxval=bound)
        b = jax.random.uniform(kb, (fan_out, 1), dtype, minval=-bound, maxval=bound)
        params.extend([w, b])
    return tuple(params)


def mlp_reference(x, params):
    """Plain-JAX reference of the same forward pass (torch-layout weights)."""
    w1, b1, w2, b2, w3, b3 = params
    h = jnp.maximum(x @ w1.T + b1[:, 0], 0.0)
    h = jnp.maximum(h @ w2.T + b2[:, 0], 0.0)
    return h @ w3.T + b3[:, 0]


if __name__ == "__main__":
    key = jax.random.PRNGKey(0)
    k_x, k_x2, k_p = jax.random.split(key, 3)

    input_channel, hidden_dim, output_channel = 16, 32, 8
    params = init_mlp_params(k_p, input_channel, hidden_dim, output_channel,
                             forward_expansion=1)

    # x: [*, input_channel] with leading dims (2, 64) -> flattened M = 128 rows
    x = jax.random.normal(k_x, (2, 64, input_channel), dtype=jnp.float32)
    out = jax.block_until_ready(mlp_pallas(x, params))
    ref = mlp_reference(x, params)
    assert out.shape == (2, 64, output_channel), out.shape
    assert jnp.allclose(out, ref, atol=1e-5, rtol=1e-5), "f32 mismatch vs reference"

    # Non-128-divisible flattened batch exercises the padding path (M = 150 -> padded 256,
    # grid of 2 parallel steps).
    x_ragged = jax.random.normal(k_x2, (3, 50, input_channel), dtype=jnp.float32)
    out_r = jax.block_until_ready(mlp_pallas(x_ragged, params))
    ref_r = mlp_reference(x_ragged, params)
    assert out_r.shape == (3, 50, output_channel), out_r.shape
    assert jnp.allclose(out_r, ref_r, atol=1e-5, rtol=1e-5), "ragged mismatch vs reference"

    # bf16 weights + in-kernel activation cast (f32 accumulation) vs. f32 reference.
    out_bf16 = jax.block_until_ready(mlp_pallas(x, params, use_bf16=True))
    assert out_bf16.shape == (2, 64, output_channel), out_bf16.shape
    assert jnp.allclose(out_bf16, ref, atol=1e-1, rtol=1e-1), "bf16 mismatch vs reference"

    print("KERNEL_OK")
</pallas_src>

<mosaic_0001>
module attributes {stable_mosaic.version = 11 : i64} {
  func.func @mlp_kernel(%arg0: i32, %arg1: memref<128x16xf32, #tpu.memory_space<vmem>>, %arg2: memref<32x16xf32, #tpu.memory_space<vmem>>, %arg3: memref<32x1xf32, #tpu.memory_space<vmem>>, %arg4: memref<32x32xf32, #tpu.memory_space<vmem>>, %arg5: memref<32x1xf32, #tpu.memory_space<vmem>>, %arg6: memref<8x32xf32, #tpu.memory_space<vmem>>, %arg7: memref<8x1xf32, #tpu.memory_space<vmem>>, %arg8: memref<8x128xf32, #tpu.memory_space<vmem>>) attributes {dimension_semantics = [#tpu.dimension_semantics<parallel>], iteration_bounds = array<i64: 1>, scalar_prefetch = 0 : i64, scratch_operands = 0 : i64, tpu.core_type = #tpu.core_type<tc>, window_params = [{transform_indices = @transform_0, window_bounds = array<i64: 128, 16>}, {pipeline_mode = #tpu.pipeline_mode<synchronous>, transform_indices = @transform_1, window_bounds = array<i64: 32, 16>}, {pipeline_mode = #tpu.pipeline_mode<synchronous>, transform_indices = @transform_2, window_bounds = array<i64: 32, 1>}, {pipeline_mode = #tpu.pipeline_mode<synchronous>, transform_indices = @transform_3, window_bounds = array<i64: 32, 32>}, {pipeline_mode = #tpu.pipeline_mode<synchronous>, transform_indices = @transform_4, window_bounds = array<i64: 32, 1>}, {pipeline_mode = #tpu.pipeline_mode<synchronous>, transform_indices = @transform_5, window_bounds = array<i64: 8, 32>}, {pipeline_mode = #tpu.pipeline_mode<synchronous>, transform_indices = @transform_6, window_bounds = array<i64: 8, 1>}, {transform_indices = @transform_7, window_bounds = array<i64: 8, 128>}]} {
    %c0 = arith.constant 0 : index
    %c0_0 = arith.constant 0 : index
    %0 = vector.load %arg1[%c0, %c0_0] : memref<128x16xf32, #tpu.memory_space<vmem>>, vector<128x16xf32>
    %c0_1 = arith.constant 0 : index
    %c0_2 = arith.constant 0 : index
    %1 = vector.load %arg2[%c0_1, %c0_2] : memref<32x16xf32, #tpu.memory_space<vmem>>, vector<32x16xf32>
    %cst = arith.constant dense<0.000000e+00> : vector<32x128xf32>
    %2 = tpu.matmul %1, %0, %cst {dimension_numbers = #tpu.dot_dimension_numbers<[1], [1], [0], [0], [0, 0, 1, 0], [], []>} : vector<32x16xf32>, vector<128x16xf32>, vector<32x128xf32> -> vector<32x128xf32>
    %c0_3 = arith.constant 0 : index
    %c0_4 = arith.constant 0 : index
    %3 = vector.load %arg3[%c0_3, %c0_4] : memref<32x1xf32, #tpu.memory_space<vmem>>, vector<32x1xf32>
    %4 = vector.broadcast %3 : vector<32x1xf32> to vector<32x128xf32>
    %5 = arith.addf %2, %4 : vector<32x128xf32>
    %cst_5 = arith.constant 0.000000e+00 : f32
    %6 = vector.broadcast %cst_5 : f32 to vector<32x128xf32>
    %7 = arith.maximumf %5, %6 : vector<32x128xf32>
    %c0_6 = arith.constant 0 : index
    %c0_7 = arith.constant 0 : index
    %8 = vector.load %arg4[%c0_6, %c0_7] : memref<32x32xf32, #tpu.memory_space<vmem>>, vector<32x32xf32>
    %cst_8 = arith.constant dense<0.000000e+00> : vector<32x128xf32>
    %9 = tpu.matmul %8, %7, %cst_8 {dimension_numbers = #tpu.dot_dimension_numbers<[1], [0], [0], [1], [0, 0, 1, 1], [], []>} : vector<32x32xf32>, vector<32x128xf32>, vector<32x128xf32> -> vector<32x128xf32>
    %c0_9 = arith.constant 0 : index
    %c0_10 = arith.constant 0 : index
    %10 = vector.load %arg5[%c0_9, %c0_10] : memref<32x1xf32, #tpu.memory_space<vmem>>, vector<32x1xf32>
    %11 = vector.broadcast %10 : vector<32x1xf32> to vector<32x128xf32>
    %12 = arith.addf %9, %11 : vector<32x128xf32>
    %cst_11 = arith.constant 0.000000e+00 : f32
    %13 = vector.broadcast %cst_11 : f32 to vector<32x128xf32>
    %14 = arith.maximumf %12, %13 : vector<32x128xf32>
    %c0_12 = arith.constant 0 : index
    %c0_13 = arith.constant 0 : index
    %15 = vector.load %arg6[%c0_12, %c0_13] : memref<8x32xf32, #tpu.memory_space<vmem>>, vector<8x32xf32>
    %cst_14 = arith.constant dense<0.000000e+00> : vector<8x128xf32>
    %16 = tpu.matmul %15, %14, %cst_14 {dimension_numbers = #tpu.dot_dimension_numbers<[1], [0], [0], [1], [0, 0, 1, 1], [], []>} : vector<8x32xf32>, vector<32x128xf32>, vector<8x128xf32> -> vector<8x128xf32>
    %c0_15 = arith.constant 0 : index
    %c0_16 = arith.constant 0 : index
    %17 = vector.load %arg7[%c0_15, %c0_16] : memref<8x1xf32, #tpu.memory_space<vmem>>, vector<8x1xf32>
    %18 = vector.broadcast %17 : vector<8x1xf32> to vector<8x128xf32>
    %19 = arith.addf %16, %18 : vector<8x128xf32>
    %c0_17 = arith.constant 0 : index
    %c0_18 = arith.constant 0 : index
    %20 = vector.load %arg8[%c0_17, %c0_18] : memref<8x128xf32, #tpu.memory_space<vmem>>, vector<8x128xf32>
    tpu.vector_store %arg8[%c0_17, %c0_18], %19 {strides = array<i32>} : memref<8x128xf32, #tpu.memory_space<vmem>>, vector<8x128xf32>,
    return
  }
  func.func @transform_0(%arg0: i32) -> (i32, i32) {
    %c0_i32 = arith.constant 0 : i32
    %c0_i32_0 = arith.constant 0 : i32
    return %arg0, %c0_i32 : i32, i32
  }
  func.func @transform_1(%arg0: i32) -> (i32, i32) {
    %c0_i32 = arith.constant 0 : i32
    %c0_i32_0 = arith.constant 0 : i32
    %c0_i32_1 = arith.constant 0 : i32
    return %c0_i32, %c0_i32_0 : i32, i32
  }
  func.func @transform_2(%arg0: i32) -> (i32, i32) {
    %c0_i32 = arith.constant 0 : i32
    %c0_i32_0 = arith.constant 0 : i32
    %c0_i32_1 = arith.constant 0 : i32
    return %c0_i32, %c0_i32_0 : i32, i32
  }
  func.func @transform_3(%arg0: i32) -> (i32, i32) {
    %c0_i32 = arith.constant 0 : i32
    %c0_i32_0 = arith.constant 0 : i32
    %c0_i32_1 = arith.constant 0 : i32
    return %c0_i32, %c0_i32_0 : i32, i32
  }
  func.func @transform_4(%arg0: i32) -> (i32, i32) {
    %c0_i32 = arith.constant 0 : i32
    %c0_i32_0 = arith.constant 0 : i32
    %c0_i32_1 = arith.constant 0 : i32
    return %c0_i32, %c0_i32_0 : i32, i32
  }
  func.func @transform_5(%arg0: i32) -> (i32, i32) {
    %c0_i32 = arith.constant 0 : i32
    %c0_i32_0 = arith.constant 0 : i32
    %c0_i32_1 = arith.constant 0 : i32
    return %c0_i32, %c0_i32_0 : i32, i32
  }
  func.func @transform_6(%arg0: i32) -> (i32, i32) {
    %c0_i32 = arith.constant 0 : i32
    %c0_i32_0 = arith.constant 0 : i32
    %c0_i32_1 = arith.constant 0 : i32
    return %c0_i32, %c0_i32_0 : i32, i32
  }
  func.func @transform_7(%arg0: i32) -> (i32, i32) {
    %c0_i32 = arith.constant 0 : i32
    %c0_i32_0 = arith.constant 0 : i32
    return %c0_i32, %arg0 : i32, i32
  }
}

</mosaic_0001>

<bundles_post_ra>
// kernel: mlp_pallas.1
= control target key start
LH: loop header
LB: loop body
LE: loop exit
PB: predicated region body
PF: predicated region fallthrough
CT: control target
= control target key end

     0   :  { %vm70_vm0 = vcmask 130048   ;;  %v624_v3 = vmov 0   ;;  %vm248_vm2 = vcmask 261120   ;;  %v625_v61 = vmov 0.0|0.0   ;;  %s820_s0 = inlined_call_operand.vmem [shape: f32[128,16], index: 0, kind: input, shape index: {}]   ;;  %s821_s1 = inlined_call_operand.vmem [shape: f32[32,16], index: 1, kind: input, shape index: {}]   ;;  %s822_s2 = inlined_call_operand.vmem [shape: f32[32,1], index: 2, kind: input, shape index: {}]   ;;  %s823_s4 = inlined_call_operand.vmem [shape: f32[32,1], index: 4, kind: input, shape index: {}]   ;;  %s824_s6 = inlined_call_operand.vmem [shape: f32[8,1], index: 6, kind: input, shape index: {}]   ;;  %s825_s3 = inlined_call_operand.vmem [shape: f32[32,32], index: 3, kind: input, shape index: {}]   ;;  %s826_s5 = inlined_call_operand.vmem [shape: f32[8,32], index: 5, kind: input, shape index: {}]   ;;  %s827_s7 = inlined_call_operand.vmem [shape: f32[8,128], index: 7, kind: output, shape index: {}]  }
   0x1   :  { %v26_v0 = vld [vmem:[%s820_s0] sm:$0xff]  ;;  %v27_v1 = vld [vmem:[%s820_s0 + $0x8] sm:$0xff]  ;;  %vm676_vm1 = vmpackc.low %vm70_vm0, %vm70_vm0  ;;  %622 = vset.pattern.permute.xlu0 %v624_v3  ;;  %623 = vset.pattern.permute.xlu1 %v624_v3  ;;  %vm626_vm3 = vmmov 0   ;;  %v627_v62 = vmov 0.0  }
   0x2   :  { %v556_v4 = vpack.c.bf16 %v27_v1, %v26_v0  ;;  %v28_v5 = vld [vmem:[%s820_s0 + $0x10] sm:$0xff]  ;;  %v29_v6 = vld [vmem:[%s820_s0 + $0x18] sm:$0xff]  ;;  %v42_v8 = vld [vmem:[%s821_s1] sm:$0xff] }
   0x3   :  { %v562_v7 = vpack.c.bf16 %v29_v6, %v28_v5  ;;  %v30_v9 = vld [vmem:[%s820_s0 + $0x20] sm:$0xff]  ;;  %v31_v10 = vld [vmem:[%s820_s0 + $0x28] sm:$0xff]  ;;  %525 = vmatprep.mubr.msk.f32.mxu0 %vm70_vm0, %v42_v8  ;;  %v48_v12 = vld [vmem:[%s822_s2 + $0x10] sm:$0xff] }
   0x4   :  { %558 = vmatprep.subr.msk.bf16.mxu0 %vm676_vm1, %v556_v4  ;;  %v46_v11 = vld [vmem:[%s822_s2] sm:$0xff]  ;;  %62 = vperm.xlu1 %623, %v48_v12   ;;  %v568_v13 = vpack.c.bf16 %v31_v10, %v30_v9  ;;  %v47_v14 = vld [vmem:[%s822_s2 + $0x8] sm:$0xff]  ;;  %v49_v15 = vld [vmem:[%s822_s2 + $0x18] sm:$0xff] }
   0x5   :  { %561 = vmatpush3.bf16.xpose.msk.msra.mxu0 %vm676_vm1, %v556_v4  ;;  %52 = vperm.xlu0 %622, %v46_v11   ;;  %v224_v16 = vld [vmem:[%s823_s4] sm:$0xff]  ;;  %v32_v17 = vld [vmem:[%s820_s0 + $0x30] sm:$0xff]  ;;  %v33_v18 = vld [vmem:[%s820_s0 + $0x38] sm:$0xff] }
   0x6   :  { %564 = vmatprep.subr.msk.bf16.mxu0 %vm676_vm1, %v562_v7  ;;  %v225_v19 = vld [vmem:[%s823_s4 + $0x8] sm:$0xff]  ;;  %v574_v20 = vpack.c.bf16 %v33_v18, %v32_v17  ;;  %v226_v21 = vld [vmem:[%s823_s4 + $0x10] sm:$0xff]  ;;  %v227_v22 = vld [vmem:[%s823_s4 + $0x18] sm:$0xff] }
   0x7   :  { %v351_v23 = vld [vmem:[%s824_s6] sm:$0xff]  ;;  %v35_v25 = vld [vmem:[%s820_s0 + $0x48] sm:$0xff]  ;;  %v36_v27 = vld [vmem:[%s820_s0 + $0x50] sm:$0xff] }
   0x8   :  { %67 = vperm.xlu1 %623, %v49_v15   ;;  %v34_v24 = vld [vmem:[%s820_s0 + $0x40] sm:$0xff]  ;;  %v37_v28 = vld [vmem:[%s820_s0 + $0x58] sm:$0xff]  ;;  %v39_v31 = vld [vmem:[%s820_s0 + $0x68] sm:$0xff] }
   0x9   :  { %57 = vperm.xlu0 %622, %v47_v14   ;;  %v580_v26 = vpack.c.bf16 %v35_v25, %v34_v24  ;;  %v586_v29 = vpack.c.bf16 %v37_v28, %v36_v27  ;;  %v38_v30 = vld [vmem:[%s820_s0 + $0x60] sm:$0xff]  ;;  %v40_v33 = vld [vmem:[%s820_s0 + $0x70] sm:$0xff]  ;;  %v41_v34 = vld [vmem:[%s820_s0 + $0x78] sm:$0xff] }
   0xa   :  { %v592_v32 = vpack.c.bf16 %v39_v31, %v38_v30  ;;  %v598_v35 = vpack.c.bf16 %v41_v34, %v40_v33  ;;  %v43_v36 = vld [vmem:[%s821_s1 + $0x8] sm:$0xff]  ;;  %v44_v37 = vld [vmem:[%s821_s1 + $0x10] sm:$0xff]  ;;  %v45_v38 = vld [vmem:[%s821_s1 + $0x18] sm:$0xff] }
   0xb   :  { %v220_v39 = vld [vmem:[%s825_s3] sm:$0xff]  ;;  %v221_v58 = vld [vmem:[%s825_s3 + $0x8] sm:$0xff]  ;;  %v222_v59 = vld [vmem:[%s825_s3 + $0x10] sm:$0xff] }
   0xc   :  { %235 = vperm.xlu1 %623, %v225_v19   ;;  %539 = vmatprep.mubr.msk.f32.mxu1 %vm248_vm2, %v220_v39  ;;  %v223_v60 = vld [vmem:[%s825_s3 + $0x18] sm:$0xff]  ;;  %v350_v17 = vld [vmem:[%s826_s5] sm:$0xff] }
   0xd   :  { %567 = vmatpush3.bf16.xpose.msk.msra.mxu0 %vm676_vm1, %v562_v7  ;;  %230 = vperm.xlu0 %622, %v224_v16  }
   0xe   :  { %570 = vmatprep.subr.msk.bf16.mxu0 %vm676_vm1, %v568_v13 }
  0x10   :  { %245 = vperm.xlu1 %623, %v227_v22  }
  0x11   :  { %240 = vperm.xlu0 %622, %v226_v21  }
  0x15   :  { %573 = vmatpush3.bf16.xpose.msk.msra.mxu0 %vm676_vm1, %v568_v13  ;;  %354 = vperm.xlu0 %622, %v351_v23  }
  0x16   :  { %576 = vmatprep.subr.msk.bf16.mxu0 %vm676_vm1, %v574_v20 }
  0x1d   :  { %579 = vmatpush3.bf16.xpose.msk.msra.mxu0 %vm676_vm1, %v574_v20 }
  0x1e   :  { %582 = vmatprep.subr.msk.bf16.mxu0 %vm676_vm1, %v580_v26 }
  0x25   :  { %585 = vmatpush3.bf16.xpose.msk.msra.mxu0 %vm676_vm1, %v580_v26 }
  0x26   :  { %588 = vmatprep.subr.msk.bf16.mxu0 %vm676_vm1, %v586_v29 }
  0x2d   :  { %591 = vmatpush3.bf16.xpose.msk.msra.mxu0 %vm676_vm1, %v586_v29 }
  0x2e   :  { %594 = vmatprep.subr.msk.bf16.mxu0 %vm676_vm1, %v592_v32 }
  0x35   :  { %597 = vmatpush3.bf16.xpose.msk.msra.mxu0 %vm676_vm1, %v592_v32 }
  0x36   :  { %600 = vmatprep.subr.msk.bf16.mxu0 %vm676_vm1, %v598_v35 }
  0x3d   :  { %603 = vmatpush3.bf16.xpose.msk.msra.mxu0 %vm676_vm1, %v598_v35 }
  0x44   :  { %526 = vmatmul.mubr.msk.f32.vlgmr.msra.gmra.mrb[0].mxu0 %vm70_vm0, %v43_v36 }
  0x45   :  { %528 = vmatprep.mubr.msk.f32.mxu0 %vm70_vm0, %v44_v37 }
  0x48   :  { %529 = vmatmul.mubr.msk.f32.gmra.mrb[2].mxu0 %vm70_vm0, %v45_v38 }
  0x83   :  { %v63_v41 = vpop.permute.xlu1 %62 }
  0x84   :  { %v53_v40 = vpop.permute.xlu0 %52 }
  0x87   :  { %v68_v48 = vpop.permute.xlu1 %67 }
  0x88   :  { %v58_v42 = vpop.permute.xlu0 %57 }
  0x8b   :  { %v236_v63 = vpop.permute.xlu1 %235 }
  0x8c   :  { %v231_v0 = vpop.permute.xlu0 %230 }
  0x8f   :  { %v246_v6 = vpop.permute.xlu1 %245 }
  0x90   :  { %v241_v9 = vpop.permute.xlu0 %240 }
  0x94   :  { %v355_v18 = vpop.permute.xlu0 %354 }
 0x117   :  { %v527_v43 = vpop.f32.mrb[0].mxu0 }
 0x118   :  { %v203_v44 = vadd.f32 %v527_v43, %v58_v42  ;;  %v197_v45 = vpop.f32.mrb[1].mxu0 }
 0x119   :  { %v198_v46 = vadd.f32 %v197_v45, %v53_v40 }
 0x11a   :  { %v217_v47 = vmax.f32 %v203_v44, 0.0 }
 0x11b   :  { %v216_v49 = vmax.f32 %v198_v46, 0.0  ;;  %v530_v50 = vpop.f32.mrb[2].mxu0 }
 0x11c   :  { %v213_v51 = vadd.f32 %v530_v50, %v68_v48  ;;  %v207_v52 = vpop.f32.mrb[3].mxu0 }
 0x11d   :  { %v208_v53 = vadd.f32 %v207_v52, %v63_v41  ;;  %v604_v54 = vpack.c.bf16 %v217_v47, %v216_v49 }
 0x11e   :  { %v219_v55 = vmax.f32 %v213_v51, 0.0 }
 0x11f   :  { %v218_v56 = vmax.f32 %v208_v53, 0.0  ;;  %605 = vmatprep.subr.bf16.mxu1 %v604_v54 }
 0x120   :  { %607 = vmatpush3.bf16.msra.mxu1 %v604_v54 }
 0x121   :  { %v608_v57 = vpack.c.bf16 %v219_v55, %v218_v56 }
 0x123   :  { %609 = vmatprep.subr.bf16.mxu1 %v608_v57 }
 0x124   :  { %611 = vmatpush3.bf16.msra.mxu1 %v608_v57 }
 0x125   :  { %612 = vmatprep.subr.bf16.mxu1 %v625_v61 }
 0x127   :  { %540 = vmatmul.mubr.msk.f32.vlgmr.msra.gmra.mrb[0].mxu1 %vm248_vm2, %v221_v58 }
 0x128   :  { %542 = vmatprep.mubr.msk.f32.mxu1 %vm248_vm2, %v222_v59 }
 0x12b   :  { %543 = vmatmul.mubr.msk.f32.gmra.mrb[2].mxu1 %vm248_vm2, %v223_v60 }
 0x12c   :  { %553 = vmatprep.mubr.msk.f32.mxu1 %vm626_vm3, %v627_v62 }
 0x1fa   :  { %v541_v1 = vpop.f32.mrb[0].mxu1 }
 0x1fb   :  { %v333_v2 = vadd.f32 %v541_v1, %v236_v63  ;;  %v327_v3 = vpop.f32.mrb[1].mxu1 }
 0x1fc   :  { %v328_v4 = vadd.f32 %v327_v3, %v231_v0 }
 0x1fd   :  { %v347_v5 = vmax.f32 %v333_v2, 0.0 }
 0x1fe   :  { %v346_v7 = vmax.f32 %v328_v4, 0.0  ;;  %v544_v8 = vpop.f32.mrb[2].mxu1 }
 0x1ff   :  { %v343_v10 = vadd.f32 %v544_v8, %v246_v6  ;;  %v337_v11 = vpop.f32.mrb[3].mxu1 }
 0x200   :  { %v613_v12 = vpack.c.bf16 %v347_v5, %v346_v7  ;;  %v338_v13 = vadd.f32 %v337_v11, %v241_v9 }
 0x201   :  { %v349_v14 = vmax.f32 %v343_v10, 0.0 }
 0x202   :  { %v348_v15 = vmax.f32 %v338_v13, 0.0  ;;  %614 = vmatpush3.bf16.msra.mxu1 %v613_v12 }
 0x203   :  { %615 = vmatprep.subr.bf16.mxu1 %v625_v61 }
 0x204   :  { %v616_v16 = vpack.c.bf16 %v349_v14, %v348_v15 }
 0x206   :  { %617 = vmatpush3.bf16.msra.mxu1 %v616_v16 }
 0x209   :  { %554 = vmatmul.mubr.msk.f32.vlgmr.msra.gmra.mrb[4].mxu1 %vm248_vm2, %v350_v17 }
 0x2dc   :  { %v426_v19 = vpop.f32.mrb[4].mxu1 }
 0x2dd   :  { %v427_v20 = vadd.f32 %v426_v19, %v355_v18  ;;  %v555_v21 = vpop.f32.mrb[5].mxu1 }
 0x2df   :  { %430 = vst [vmem:[%s827_s7] sm:$0xff] %v427_v20 }

</bundles_post_ra>
